<compile_context>
chip_gen: v6e
topology: v6e:2x2x1
jax: 0.10.0
libtpu: 0.0.40
codegen_flags: <defaults>
</compile_context>

<pallas_src>
import functools

import jax
import jax.numpy as jnp
from jax.experimental import pallas as pl
from jax.experimental.pallas import tpu as pltpu

EPS = 1e-5
_MIB = 1024 * 1024


def _vmem_capacity_bytes():
    """Physical VMEM per TensorCore (128 MiB on v5e/v6e, 64 MiB on v7x)."""
    try:
        return int(pltpu.get_tpu_info().vmem_capacity_bytes)
    except Exception:  # query unavailable -> assume the common 128 MiB parts
        return 128 * _MIB


def _tile_config():
    """Returns (batch_tile, scoped_vmem_limit, single_buffer_resident_operands)."""
    big_vmem = _vmem_capacity_bytes() >= 96 * _MIB
    if big_vmem:                       # v5e / v6e: 128 MiB physical VMEM
        return 1024, 64 * _MIB, False
    return 512, 40 * _MIB, True        # v7x: 64 MiB per TC -> smaller tile


# ---------------------------------------------------------------------------
# Fused single-tile kernel (small batch): BN stats + BN + ReLU + 2 matmuls
# ---------------------------------------------------------------------------
def fused_kernel(x_ref, gamma_ref, beta_ref, w1_ref, b1_ref, w2_ref, b2_ref,
                 o_ref):
    x = x_ref[...].astype(jnp.float32)                      # (B, 2D) resident
    mean = jnp.mean(x, axis=0, keepdims=True)
    xc = x - mean
    var = jnp.mean(xc * xc, axis=0, keepdims=True)          # centered, no cancellation
    scale = gamma_ref[...] * jax.lax.rsqrt(var + EPS)
    xn = xc * scale + beta_ref[...]
    h = jnp.maximum(xn, 0.0).astype(w1_ref.dtype)           # bf16 into the MXU
    h1 = jnp.dot(h, w1_ref[...], preferred_element_type=jnp.float32)
    h1 = jnp.maximum(h1 + b1_ref[...], 0.0).astype(w2_ref.dtype)
    out = jnp.dot(h1, w2_ref[...], preferred_element_type=jnp.float32)
    o_ref[...] = (out + b2_ref[...]).astype(o_ref.dtype)


# ---------------------------------------------------------------------------
# Pass 1 (large batch): per-tile partial sum / sum-of-squares, parallel tiles
# ---------------------------------------------------------------------------
def bn_partial_kernel(x_ref, sum_ref, sq_ref, *, batch, tile, need_mask):
    x = x_ref[...].astype(jnp.float32)                      # (TB, 2D)

    def partials(xv):
        # Sublane-preserving accumulation: reshape keeps (8, lane) tiles
        # intact, so the axis-0 sum is pure VALU adds (no XLU in the hot path).
        x3 = xv.reshape(tile // 8, 8, xv.shape[-1])
        return jnp.sum(x3, axis=0), jnp.sum(x3 * x3, axis=0)  # (8, F2) each

    s, sq = partials(x)
    sum_ref[0] = s
    sq_ref[0] = sq

    if need_mask:  # only emitted when B % TB != 0; only the last tile re-runs
        i = pl.program_id(0)

        @pl.when(i == pl.num_programs(0) - 1)
        def _():
            row = i * tile + jax.lax.broadcasted_iota(jnp.int32, x.shape, 0)
            xm = jnp.where(row < batch, x, 0.0)
            s_m, sq_m = partials(xm)
            sum_ref[0] = s_m
            sq_ref[0] = sq_m


# ---------------------------------------------------------------------------
# Pass 2 (large batch): BN affine -> ReLU -> Linear(2D,D) -> ReLU -> Linear(D,D)
# ---------------------------------------------------------------------------
def mapping_kernel(x_ref, scale_ref, shift_ref, w1_ref, b1_ref, w2_ref, b2_ref,
                   o_ref):
    x = x_ref[...].astype(jnp.float32)                      # (TB, 2D)
    xn = x * scale_ref[...] + shift_ref[...]                 # BN as affine: 2 VPU ops
    h = jnp.maximum(xn, 0.0).astype(w1_ref.dtype)            # bf16 into the MXU
    h1 = jnp.dot(h, w1_ref[...], preferred_element_type=jnp.float32)
    h1 = jnp.maximum(h1 + b1_ref[...], 0.0).astype(w2_ref.dtype)
    out = jnp.dot(h1, w2_ref[...], preferred_element_type=jnp.float32)
    o_ref[...] = (out + b2_ref[...]).astype(o_ref.dtype)


# ---------------------------------------------------------------------------
# Wrapper
# ---------------------------------------------------------------------------
def linear_mapping(x, gamma, beta, w1, b1, w2, b2):
    """x: (B, 2D) f32; w1: (2D, D) bf16; w2: (D, D) bf16. Returns (B, D) f32."""
    B, F2 = x.shape
    D = w1.shape[1]
    assert F2 == w1.shape[0] and w2.shape == (D, D)

    TB, vmem_limit, single_buffer_consts = _tile_config()

    # ---- Small batch: fused single-kernel path (x fully resident) ----------
    # TODO(synk): on v7x this single-tile path runs on one TensorCore; for
    # 256 < B <= TB one could instead force the two-pass path with two tiles
    # to use both cores (trades an extra HBM read of x for 2x TC parallelism).
    if B <= TB:
        return pl.pallas_call(
            fused_kernel,
            out_shape=jax.ShapeDtypeStruct((B, D), jnp.float32),
            compiler_params=pltpu.CompilerParams(vmem_limit_bytes=vmem_limit),
        )(x, gamma, beta, w1, b1, w2, b2)

    n_tiles = pl.cdiv(B, TB)
    need_mask = (B % TB) != 0

    # ---- Pass 1: per-tile partial statistics (parallel across tiles) -------
    psum, psq = pl.pallas_call(
        functools.partial(bn_partial_kernel, batch=B, tile=TB,
                          need_mask=need_mask),
        out_shape=(jax.ShapeDtypeStruct((n_tiles, 8, F2), jnp.float32),
                   jax.ShapeDtypeStruct((n_tiles, 8, F2), jnp.float32)),
        grid=(n_tiles,),
        in_specs=[pl.BlockSpec((TB, F2), lambda i: (i, 0))],
        out_specs=(pl.BlockSpec((1, 8, F2), lambda i: (i, 0, 0)),
                   pl.BlockSpec((1, 8, F2), lambda i: (i, 0, 0))),
        compiler_params=pltpu.CompilerParams(
            dimension_semantics=("parallel",),   # both v7x TCs stream x
            vmem_limit_bytes=vmem_limit),
    )(x)

    # Tiny finalize (F2-length vectors) as plain XLA: f32 reduction of the
    # per-tile partials -> per-feature scale/shift for the BN affine.
    total = jnp.sum(psum, axis=(0, 1))
    total_sq = jnp.sum(psq, axis=(0, 1))
    mean = total / B
    var = jnp.maximum(total_sq / B - mean * mean, 0.0)       # biased batch var
    scale = gamma * jax.lax.rsqrt(var + EPS)                 # (1, F2)
    shift = beta - mean * scale                              # (1, F2)

    # ---- Pass 2: batch-tiled main kernel, weights resident across tiles ----
    def const_spec(shape):
        # Constant index map -> block resident across all batch tiles.  On
        # small-VMEM chips (v7x) also drop double-buffering for these blocks:
        # their block index never changes, so extra buffers only burn VMEM.
        if single_buffer_consts:
            return pl.BlockSpec(shape, lambda i: (0, 0),
                                pipeline_mode=pl.Buffered(1))
        return pl.BlockSpec(shape, lambda i: (0, 0))

    cost = pl.CostEstimate(
        flops=2 * B * (F2 * D + D * D),
        transcendentals=0,
        bytes_accessed=(x.size * x.dtype.itemsize
                        + w1.size * w1.dtype.itemsize
                        + w2.size * w2.dtype.itemsize
                        + B * D * 4),
    )

    # NOTE: a partial last tile runs padded garbage rows through BN/matmuls;
    # rows are independent and Pallas discards the out-of-range output rows,
    # so keep the out_spec block shape tied to TB if the tiling changes.
    return pl.pallas_call(
        mapping_kernel,
        out_shape=jax.ShapeDtypeStruct((B, D), jnp.float32),
        grid=(n_tiles,),
        in_specs=[
            pl.BlockSpec((TB, F2), lambda i: (i, 0)),        # x tile (streamed)
            const_spec((1, F2)),                             # scale   (resident)
            const_spec((1, F2)),                             # shift   (resident)
            const_spec((F2, D)),                             # w1 bf16 (resident)
            const_spec((1, D)),                              # b1      (resident)
            const_spec((D, D)),                              # w2 bf16 (resident)
            const_spec((1, D)),                              # b2      (resident)
        ],
        out_specs=pl.BlockSpec((TB, D), lambda i: (i, 0)),
        compiler_params=pltpu.CompilerParams(
            dimension_semantics=("parallel",),               # megacore sharding
            vmem_limit_bytes=vmem_limit),
        cost_estimate=cost,
    )(x, scale, shift, w1, b1, w2, b2)


# ---------------------------------------------------------------------------
# Parameters + pure-JAX reference
# ---------------------------------------------------------------------------
def init_params(key, image_embed_dim):
    D = image_embed_dim
    k = jax.random.split(key, 6)
    # BatchNorm1d(2D): gamma, beta (f32)
    gamma = 1.0 + 0.1 * jax.random.normal(k[0], (1, 2 * D), jnp.float32)
    beta = 0.1 * jax.random.normal(k[1], (1, 2 * D), jnp.float32)
    # Linear(2D -> D): weight stored transposed (2D, D), quantized to bf16
    lim1 = 1.0 / jnp.sqrt(2.0 * D)
    w1 = jax.random.uniform(k[2], (2 * D, D), jnp.float32, -lim1, lim1
                            ).astype(jnp.bfloat16)
    b1 = jax.random.uniform(k[3], (1, D), jnp.float32, -lim1, lim1)
    # Linear(D -> D)
    lim2 = 1.0 / jnp.sqrt(1.0 * D)
    w2 = jax.random.uniform(k[4], (D, D), jnp.float32, -lim2, lim2
                            ).astype(jnp.bfloat16)
    b2 = jax.random.uniform(k[5], (1, D), jnp.float32, -lim2, lim2)
    return gamma, beta, w1, b1, w2, b2


def reference(x, gamma, beta, w1, b1, w2, b2):
    # f32 reference using the (bf16-stored) weights dequantized to f32, so the
    # comparison isolates kernel error (bf16 activations + MXU accumulation).
    w1f = w1.astype(jnp.float32)
    w2f = w2.astype(jnp.float32)
    mean = jnp.mean(x, axis=0, keepdims=True)
    var = jnp.mean((x - mean) ** 2, axis=0, keepdims=True)
    xn = (x - mean) / jnp.sqrt(var + EPS) * gamma + beta
    h = jnp.maximum(xn, 0.0)
    h1 = jnp.maximum(h @ w1f + b1, 0.0)
    return h1 @ w2f + b2


if __name__ == "__main__":
    image_embed_dim = 32   # small stand-in for the default 512
    key = jax.random.PRNGKey(0)
    kx1, kx2, kp = jax.random.split(key, 3)
    params = init_params(kp, image_embed_dim)

    # --- small batch: exercises the fused single-kernel path ----------------
    # The PyTorch module receives a tuple and consumes x[0].
    x_small = (jax.random.normal(kx1, (8, 2 * image_embed_dim), jnp.float32),)
    out_s = jax.block_until_ready(linear_mapping(x_small[0], *params))
    ref_s = reference(x_small[0], *params)
    assert out_s.shape == (8, image_embed_dim)
    assert jnp.allclose(out_s, ref_s, atol=2e-2, rtol=2e-2), \
        float(jnp.max(jnp.abs(out_s - ref_s)))

    # --- larger batch: exercises the two-pass tiled path incl. partial tile -
    TB, _, _ = _tile_config()
    B_big = TB + 20   # forces 2 tiles with a masked partial last tile
    x_big = jax.random.normal(kx2, (B_big, 2 * image_embed_dim), jnp.float32)
    out_b = jax.block_until_ready(linear_mapping(x_big, *params))
    ref_b = reference(x_big, *params)
    assert out_b.shape == (B_big, image_embed_dim)
    assert jnp.allclose(out_b, ref_b, atol=2e-2, rtol=2e-2), \
        float(jnp.max(jnp.abs(out_b - ref_b)))

    print("KERNEL_OK")
</pallas_src>

<mosaic_0001>
module attributes {stable_mosaic.version = 11 : i64} {
  func.func @fused_kernel(%arg0: memref<8x64xf32, #tpu.memory_space<vmem>>, %arg1: memref<1x64xf32, #tpu.memory_space<vmem>>, %arg2: memref<1x64xf32, #tpu.memory_space<vmem>>, %arg3: memref<64x32xbf16, #tpu.memory_space<vmem>>, %arg4: memref<1x32xf32, #tpu.memory_space<vmem>>, %arg5: memref<32x32xbf16, #tpu.memory_space<vmem>>, %arg6: memref<1x32xf32, #tpu.memory_space<vmem>>, %arg7: memref<8x32xf32, #tpu.memory_space<vmem>>) attributes {dimension_semantics = [], scalar_prefetch = 0 : i64, scratch_operands = 0 : i64, tpu.core_type = #tpu.core_type<tc>} {
    %c0 = arith.constant 0 : index
    %c0_0 = arith.constant 0 : index
    %0 = vector.load %arg0[%c0, %c0_0] : memref<8x64xf32, #tpu.memory_space<vmem>>, vector<8x64xf32>
    %cst = arith.constant dense<0.000000e+00> : vector<64xf32>
    %1 = vector.multi_reduction <add>, %0, %cst [0] : vector<8x64xf32> to vector<64xf32>
    %2 = vector.shape_cast %1 : vector<64xf32> to vector<1x64xf32>
    %cst_1 = arith.constant 8.000000e+00 : f32
    %3 = vector.broadcast %cst_1 : f32 to vector<1x64xf32>
    %4 = arith.divf %2, %3 : vector<1x64xf32>
    %5 = vector.broadcast %4 : vector<1x64xf32> to vector<8x64xf32>
    %6 = arith.subf %0, %5 : vector<8x64xf32>
    %7 = arith.mulf %6, %6 : vector<8x64xf32>
    %cst_2 = arith.constant dense<0.000000e+00> : vector<64xf32>
    %8 = vector.multi_reduction <add>, %7, %cst_2 [0] : vector<8x64xf32> to vector<64xf32>
    %9 = vector.shape_cast %8 : vector<64xf32> to vector<1x64xf32>
    %cst_3 = arith.constant 8.000000e+00 : f32
    %10 = vector.broadcast %cst_3 : f32 to vector<1x64xf32>
    %11 = arith.divf %9, %10 : vector<1x64xf32>
    %c0_4 = arith.constant 0 : index
    %c0_5 = arith.constant 0 : index
    %12 = vector.load %arg1[%c0_4, %c0_5] : memref<1x64xf32, #tpu.memory_space<vmem>>, vector<1x64xf32>
    %cst_6 = arith.constant 9.99999974E-6 : f32
    %13 = vector.broadcast %cst_6 : f32 to vector<1x64xf32>
    %14 = arith.addf %11, %13 : vector<1x64xf32>
    %15 = math.rsqrt %14 : vector<1x64xf32>
    %16 = arith.mulf %12, %15 : vector<1x64xf32>
    %17 = vector.broadcast %16 : vector<1x64xf32> to vector<8x64xf32>
    %18 = arith.mulf %6, %17 : vector<8x64xf32>
    %c0_7 = arith.constant 0 : index
    %c0_8 = arith.constant 0 : index
    %19 = vector.load %arg2[%c0_7, %c0_8] : memref<1x64xf32, #tpu.memory_space<vmem>>, vector<1x64xf32>
    %20 = vector.broadcast %19 : vector<1x64xf32> to vector<8x64xf32>
    %21 = arith.addf %18, %20 : vector<8x64xf32>
    %cst_9 = arith.constant 0.000000e+00 : f32
    %22 = vector.broadcast %cst_9 : f32 to vector<8x64xf32>
    %23 = arith.maximumf %21, %22 : vector<8x64xf32>
    %24 = arith.truncf %23 : vector<8x64xf32> to vector<8x64xbf16>
    %c0_10 = arith.constant 0 : index
    %c0_11 = arith.constant 0 : index
    %25 = vector.load %arg3[%c0_10, %c0_11] : memref<64x32xbf16, #tpu.memory_space<vmem>>, vector<64x32xbf16>
    %cst_12 = arith.constant dense<0.000000e+00> : vector<8x32xf32>
    %26 = tpu.matmul %24, %25, %cst_12 {dimension_numbers = #tpu.dot_dimension_numbers<[1], [0], [0], [1], [0, 0, 1, 1], [], []>} : vector<8x64xbf16>, vector<64x32xbf16>, vector<8x32xf32> -> vector<8x32xf32>
    %c0_13 = arith.constant 0 : index
    %c0_14 = arith.constant 0 : index
    %27 = vector.load %arg4[%c0_13, %c0_14] : memref<1x32xf32, #tpu.memory_space<vmem>>, vector<1x32xf32>
    %28 = vector.broadcast %27 : vector<1x32xf32> to vector<8x32xf32>
    %29 = arith.addf %26, %28 : vector<8x32xf32>
    %cst_15 = arith.constant 0.000000e+00 : f32
    %30 = vector.broadcast %cst_15 : f32 to vector<8x32xf32>
    %31 = arith.maximumf %29, %30 : vector<8x32xf32>
    %32 = arith.truncf %31 : vector<8x32xf32> to vector<8x32xbf16>
    %c0_16 = arith.constant 0 : index
    %c0_17 = arith.constant 0 : index
    %33 = vector.load %arg5[%c0_16, %c0_17] : memref<32x32xbf16, #tpu.memory_space<vmem>>, vector<32x32xbf16>
    %cst_18 = arith.constant dense<0.000000e+00> : vector<8x32xf32>
    %34 = tpu.matmul %32, %33, %cst_18 {dimension_numbers = #tpu.dot_dimension_numbers<[1], [0], [0], [1], [0, 0, 1, 1], [], []>} : vector<8x32xbf16>, vector<32x32xbf16>, vector<8x32xf32> -> vector<8x32xf32>
    %c0_19 = arith.constant 0 : index
    %c0_20 = arith.constant 0 : index
    %35 = vector.load %arg6[%c0_19, %c0_20] : memref<1x32xf32, #tpu.memory_space<vmem>>, vector<1x32xf32>
    %36 = vector.broadcast %35 : vector<1x32xf32> to vector<8x32xf32>
    %37 = arith.addf %34, %36 : vector<8x32xf32>
    %c0_21 = arith.constant 0 : index
    %c0_22 = arith.constant 0 : index
    %38 = vector.load %arg7[%c0_21, %c0_22] : memref<8x32xf32, #tpu.memory_space<vmem>>, vector<8x32xf32>
    tpu.vector_store %arg7[%c0_21, %c0_22], %37 {strides = array<i32>} : memref<8x32xf32, #tpu.memory_space<vmem>>, vector<8x32xf32>,
    return
  }
}

</mosaic_0001>

<bundles_post_ra>
// kernel: tpu_custom_call.1
= control target key start
LH: loop header
LB: loop body
LE: loop exit
PB: predicated region body
PF: predicated region fallthrough
CT: control target
= control target key end

     0   :  { %v308_v1 = vmov 0.0   ;;  %vm309_vm0 = vmmov 0   ;;  %vm29_vm1 = vcmask 523264   ;;  %s390_s0 = inlined_call_operand.vmem [shape: f32[8,64], index: 0, kind: input, shape index: {}]   ;;  %s391_s1 = inlined_call_operand.vmem [shape: f32[1,64], index: 1, kind: input, shape index: {}]   ;;  %s392_s2 = inlined_call_operand.vmem [shape: f32[1,64], index: 2, kind: input, shape index: {}]   ;;  %s393_s3 = inlined_call_operand.vmem [shape: bf16[64,32], index: 3, kind: input, shape index: {}]   ;;  %s394_s4 = inlined_call_operand.vmem [shape: f32[1,32], index: 4, kind: input, shape index: {}]   ;;  %s395_s5 = inlined_call_operand.vmem [shape: bf16[32,32], index: 5, kind: input, shape index: {}]   ;;  %s396_s6 = inlined_call_operand.vmem [shape: f32[1,32], index: 6, kind: input, shape index: {}]   ;;  %s397_s7 = inlined_call_operand.hbm [shape: f32[8,32], index: 7, kind: output, shape index: {}]  }
   0x1   :  { %v278_v0 = vld [vmem:[%s393_s3 + $0x18] sm:$0xff]   ;;  %255 = vmatprep.subr.bf16.mxu0 %v308_v1  ;;  %267 = vmatprep.subr.bf16.mxu1 %v308_v1  ;;  %v279_v2 = vld [vmem:[%s393_s3 + $0x10] sm:$0xff]   ;;  %v28_v3 = vld [vmem:[%s390_s0] sm:$0xff] }
   0x2   :  { %256 = vmatpush3.bf16.msra.mxu0 %v278_v0  ;;  %263 = vmatprep.mubr.msk.bf16.mxu0 %vm309_vm0, %v308_v1  ;;  %v30_v4 = vsel %vm29_vm1, %v28_v3, 0.0  ;;  %v280_v5 = vld [vmem:[%s393_s3 + $0x8] sm:$0xff]  }
   0x3   :  { %257 = vmatprep.subr.bf16.mxu0 %v308_v1  ;;  %271 = vmatprep.mubr.msk.bf16.mxu1 %vm309_vm0, %v308_v1  ;;  %v31_v6 = vrot.slane %v30_v4, 4 }
   0x6   :  { %258 = vmatpush3.bf16.msra.mxu0 %v279_v2 }
   0x7   :  { %259 = vmatprep.subr.bf16.mxu0 %v308_v1 }
   0x8   :  { %12 = vsyncpa [#allocation3], 0  ;;  %v32_v7 = vadd.f32 %v31_v6, %v30_v4  ;;  %v281_v8 = vld [vmem:[%s393_s3] sm:$0xff]   ;;  %v54_v25 = vlaneseq  ;;  %v282_v37 = vld [vmem:[%s395_s5 + $0x8] sm:$0xff]   ;;  %vm177_vm2 = vcmask 261120   ;;  %s310_s19 = smov [#allocation2]  }
   0x9   :  { %v49_v27 = vld [vmem:[%s391_s1] sm:$0x1]  ;;  %268 = vmatpush3.bf16.msra.mxu1 %v282_v37 }
   0xa   :  { %260 = vmatpush3.bf16.msra.mxu0 %v280_v5  ;;  %v33_v9 = vrot.slane %v32_v7, 2  ;;  %v55_v26 = vshrl.u32 %v54_v25, 7  ;;  %v236_v32 = vld [vmem:[%s392_s2] ss:$0 sm:$0xff]  ;;  %269 = vmatprep.subr.bf16.mxu1 %v308_v1 }
   0xb   :  { %261 = vmatprep.subr.bf16.mxu0 %v308_v1  ;;  %v283_v38 = vld [vmem:[%s395_s5] sm:$0xff]   ;;  %s228_s5 = sshll.u32 %s310_s19, 4  ;;  %s229_s5 = int_to_ptr.vmem [resolvable:$true] %s228_s5 }
   0xc   :  { %v34_v10 = vadd.f32 %v33_v9, %v32_v7  ;;  %v56_v28 = vsub.s32 0, %v55_v26  ;;  %v237_v39 = vld [vmem:[%s394_s4] ss:$0 sm:$0xff]  ;;  %s286_s4 = scalar_lea.vmem %s229_s5, 128  ;;  %p291_p1 = scmp.lt.s32.totalorder %s229_s5, %s229_s5 }
   0xd   :  { %270 = vmatpush3.bf16.msra.mxu1 %v283_v38  ;;  %v243_v47 = vld [vmem:[%s396_s6] ss:$0 sm:$0xff]  ;;  %p287_p0 = scmp.ne.s32.totalorder %s229_s5, %s286_s4  ;;  %p292_p2 = scmp.lt.s32.totalorder %s286_s4, %s286_s4 }
   0xe   :  { %262 = vmatpush3.bf16.msra.mxu0 %v281_v8  ;;  %v35_v11 = vrot.slane %v34_v10, 1 }
   0xf   :  { %p293_p3 = por %p292_p2, %p291_p1 }
  0x10   :  { %v36_v12 = vadd.f32 %v35_v11, %v34_v10 }
  0x11   :  { %p294_p4 = pnand %p293_p3, %p287_p0 }
  0x12   :  { %v38_v13 = vmul.f32 0.125, %v36_v12 }
  0x14   :  { %v39_v14 = vsub.f32 %v28_v3, %v38_v13 }
  0x16   :  { %v40_v15 = vmul.f32 %v39_v14, %v39_v14 }
  0x18   :  { %v41_v16 = vsel %vm29_vm1, %v40_v15, 0.0 }
  0x19   :  { %v42_v17 = vrot.slane %v41_v16, 4 }
  0x1b   :  { %v43_v18 = vadd.f32 %v42_v17, %v41_v16 }
  0x1d   :  { %v44_v19 = vrot.slane %v43_v18, 2 }
  0x1f   :  { %v45_v20 = vadd.f32 %v44_v19, %v43_v18 }
  0x21   :  { %v46_v21 = vrot.slane %v45_v20, 1 }
  0x23   :  { %v47_v22 = vadd.f32 %v46_v21, %v45_v20 }
  0x25   :  { %v48_v23 = vmul.f32 0.125, %v47_v22 }
  0x27   :  { %v50_v24 = vadd.f32 1e-05, %v48_v23 }
  0x29   :  { %284 = vrsqrt.f32 %v50_v24 }
  0x36   :  { %v285_v29 = vpop.eup %284 }
  0x37   :  { %v52_v30 = vmul.f32 %v285_v29, %v49_v27 }
  0x39   :  { %v57_v31 = vrot.slane %v52_v30, %v56_v28 }
  0x3b   :  { %v59_v33 = vmul.f32 %v57_v31, %v39_v14 }
  0x3d   :  { %v67_v34 = vadd.f32 %v236_v32, %v59_v33 }
  0x3f   :  { %v68_v35 = vmax.f32 %v67_v34, 0.0 }
  0x41   :  { %v69_v36 = vpack.c.bf16 %v68_v35, %v68_v35 }
  0x43   :  { %264 = vmatmul.mubr.msk.bf16.vlgmr.msra.gmra.mxu0 %vm29_vm1, %v69_v36 }
 0x103   :  { %v146_v40 = vpop.f32.mrf.mxu0 }
 0x104   :  { %v147_v41 = vadd.f32 %v237_v39, %v146_v40 }
 0x105   :  { %v265_v42 = vpop.f32.mrf.mxu0 }
 0x106   :  { %v152_v43 = vmax.f32 %v147_v41, 0.0 }
 0x107   :  { %v149_v44 = vpop.f32.mrf.mxu0 }
 0x108   :  { %v153_v45 = vpack.c.bf16 %v152_v43, %v152_v43 }
 0x109   :  { %v266_v46 = vpop.f32.mrf.mxu0 }
 0x10a   :  { %272 = vmatmul.mubr.msk.bf16.vlgmr.msra.gmra.mxu1 %vm177_vm2, %v153_v45 }
 0x1ca   :  { %v215_v48 = vpop.f32.mrf.mxu1 }
 0x1cb   :  { %v216_v49 = vadd.f32 %v243_v47, %v215_v48 }
 0x1cc   :  { %v273_v50 = vpop.f32.mrf.mxu1 }
 0x1cd   :  { %221 = vst.msk [vmem:[#allocation2] sm:$0xff] %vm177_vm2, %v216_v49 }
 0x1ce   :  { %v218_v51 = vpop.f32.mrf.mxu1 }
 0x1cf   :  { %297 = shalt.err (!%p294_p4)
}
 0x1d0   :  { %231 = dma.vmem_to_hbm [thread:$0]  %s229_s5, 128, %s397_s7, [#allocation3]   ;;  %v274_v52 = vpop.f32.mrf.mxu1 }
 0x1d1   :  { %306 = dma.done.wait [#allocation3], 128  }
 0x1d2   :  { %307 = vsyncadd [#allocation3], 4294967168 }
 0x1d3   :  { %235 = vsyncpa [#allocation3], 1 }

</bundles_post_ra>
